<compile_context>
chip_gen: v7x
topology: tpu7x:2x2x1
jax: 0.10.0
libtpu: 0.0.40
codegen_flags: <defaults>
</compile_context>

<pallas_src>
import math
import functools

import jax
import jax.numpy as jnp
from jax import lax
from jax.experimental import pallas as pl
from jax.experimental.pallas import tpu as pltpu


# ---------------------------------------------------------------------------
# Positional-encoding table (matches the torch buffer construction exactly,
# including the unsqueeze(1) -> shape (max_len, 1, embed_dim)).
# ---------------------------------------------------------------------------
def make_pe_table(embed_dim: int, max_len: int = 5000) -> jnp.ndarray:
    position = jnp.arange(0, max_len, dtype=jnp.float32)[:, None]          # (L, 1)
    div_term = jnp.exp(
        jnp.arange(0, embed_dim, 2, dtype=jnp.float32)
        * (-math.log(10000.0) / embed_dim)
    )                                                                       # (E/2,)
    angles = position * div_term                                            # (L, E/2)
    pe = jnp.zeros((max_len, embed_dim), dtype=jnp.float32)
    pe = pe.at[:, 0::2].set(jnp.sin(angles))
    pe = pe.at[:, 1::2].set(jnp.cos(angles))
    return pe[:, None, :]                                                   # (L, 1, E)


# ---------------------------------------------------------------------------
# Hardware / tiling helpers
# ---------------------------------------------------------------------------
def _on_tpu() -> bool:
    try:
        return jax.devices()[0].platform == "tpu"
    except Exception:
        return False


def _vmem_capacity_bytes() -> int:
    try:
        cap = getattr(pltpu.get_tpu_info(), "vmem_capacity_bytes", None)
        if cap:
            return int(cap)
    except Exception:
        pass
    return 64 << 20          # conservative (v7x-sized) default


def _pick_tiles(S, B, E, itemsize, budget_bytes):
    """Pick (tS, tB, tE) so one block stays within ~budget_bytes.

    Last-two block dims stay (8,128)/(16,128)-friendly: tE is a multiple of 128
    (or the full E), tB is a multiple of the sublane granularity (or the full B).
    """
    sub = 8 if itemsize >= 4 else 16          # packed sub-32-bit dtypes use 16 rows
    lane = 128
    # Lane-axis tile: only shrink for very wide embeddings where even a minimal
    # (sub, min(B,sub), E) slab would blow the budget.
    tE = E
    while tE > lane and sub * min(B, sub) * tE * itemsize > budget_bytes:
        tE = max(lane, ((tE // 2) // lane) * lane)
    # Batch (sublane) tile.
    tB = B
    while tB > sub and sub * tB * tE * itemsize > budget_bytes:
        tB = max(sub, ((tB // 2) // sub) * sub)
    # Sequence tile: as many rows as fit the budget.
    rows = budget_bytes // max(1, tB * tE * itemsize)
    tS = S if rows >= S else max(sub, (rows // sub) * sub)
    return tS, tB, tE, sub


def _ensure_two_blocks(S, B, tS, tB, sub):
    """Force >=2 grid steps along a parallel axis so both v7x TCs get work."""
    if tS >= S and tB >= B:
        if S >= 2 * sub:
            tS = (((S + 1) // 2) + sub - 1) // sub * sub      # < S by construction
        elif B >= 2 * sub:
            tB = (((B + 1) // 2) + sub - 1) // sub * sub
    return tS, tB


def _vmem_limit(x_tile_bytes, pe_tile_padded_bytes, cap):
    # Residency: 2x input x + 2x output + (<=2)x padded pe + slack.
    need = 4 * x_tile_bytes + 2 * pe_tile_padded_bytes + (4 << 20)
    return int(min(max(need, 32 << 20), (cap * 3) // 4))


def _pe_spec(block_shape, index_map):
    # Single-buffer the pe input on real TPUs: its block index only changes once
    # per (S,E)-tile (batch is innermost), and the size-1 middle dim pads to 8/16
    # sublanes, so Buffered(1) halves an 8x-padded footprint.
    if _on_tpu() and hasattr(pl, "Buffered"):
        try:
            return pl.BlockSpec(block_shape, index_map, pipeline_mode=pl.Buffered(1))
        except Exception:
            pass
    return pl.BlockSpec(block_shape, index_map)


# ---------------------------------------------------------------------------
# Kernels
# ---------------------------------------------------------------------------
def pe_add_kernel(x_ref, pe_ref, o_ref):
    # x_ref: (tS, tB, tE), pe_ref: (tS, 1, tE).  Batch broadcast over the size-1
    # sublane axis is a VPU broadcast; pure elementwise add, no relayout.
    o_ref[...] = x_ref[...] + pe_ref[...]


def pe_add_dropout_kernel(seed_ref, x_ref, pe_ref, o_ref, *, p, scale,
                          stride_s, stride_b):
    # Inverted dropout (training mode).  y / scale / select all stay in x.dtype.
    y = x_ref[...] + pe_ref[...]
    tS, tB, tE = x_ref.shape
    s_off = pl.program_id(0) * tS
    e_off = pl.program_id(1) * tE
    b_off = pl.program_id(2) * tB
    shp = y.shape
    gs = lax.broadcasted_iota(jnp.int32, shp, 0) + s_off
    gb = lax.broadcasted_iota(jnp.int32, shp, 1) + b_off
    ge = lax.broadcasted_iota(jnp.int32, shp, 2) + e_off
    # Global element id; the mask depends only on (seed, element), never on the
    # tiling, and rides entirely under the HBM DMA (VPU has slack).
    idx = gs * stride_s + gb * stride_b + ge
    # Counter-based hash (lowbias32).  Portable to both Mosaic and the CPU
    # interpreter (no pltpu.prng_* primitives).  Seed is diffused with an odd
    # multiplier before mixing, so adjacent base seeds do not collide.
    h = idx.astype(jnp.uint32) + seed_ref[0].astype(jnp.uint32) * jnp.uint32(2654435769)
    h = (h ^ (h >> 16)) * jnp.uint32(2146121005)
    h = (h ^ (h >> 15)) * jnp.uint32(2221713035)
    h = h ^ (h >> 16)
    u = (h & jnp.uint32(0x7FFFFF)).astype(jnp.int32).astype(jnp.float32) \
        * (1.0 / (1 << 23))
    keep = u >= jnp.float32(p)        # P(drop) ~= p (2^-23 quantization)
    o_ref[...] = jnp.where(keep, y * jnp.asarray(scale, dtype=y.dtype),
                           jnp.zeros_like(y))


# ---------------------------------------------------------------------------
# Wrapper
# ---------------------------------------------------------------------------
def positional_encoding(x, pe_table, *, p=0.1, training=False, seed=0):
    """Apply positional encoding (and inverted dropout if training).

    x: (seq_len, batch, embed_dim), any float dtype (f32 / bf16).
    pe_table: (max_len, 1, embed_dim) or (max_len, embed_dim), float32.
    """
    S, B, E = x.shape
    if pe_table.ndim == 2:
        pe_table = pe_table[:, None, :]
    pe_slice = pe_table[:S].astype(x.dtype)          # (S, 1, E)

    # Lane-sparse embed dims (E % 128 != 0) would force masked partial stores and
    # up-to-4x wasted HBM bandwidth in the Pallas layout; the fused XLA
    # broadcast-add already runs at the HBM roofline for this elementwise op.
    if E % 128 != 0:
        y = x + pe_slice
        if training and p > 0.0:
            if p >= 1.0:
                return jnp.zeros_like(x)
            keep = jax.random.bernoulli(jax.random.PRNGKey(seed), 1.0 - p, y.shape)
            y = jnp.where(keep, y / (1.0 - p), 0).astype(x.dtype)
        return y

    itemsize = jnp.dtype(x.dtype).itemsize
    cap = _vmem_capacity_bytes()
    budget = min(4 << 20, max(1 << 20, cap // 16))   # per-tile budget, gen-aware
    tS, tB, tE, sub = _pick_tiles(S, B, E, itemsize, budget)
    tS, tB = _ensure_two_blocks(S, B, tS, tB, sub)
    nS, nB, nE = pl.cdiv(S, tS), pl.cdiv(B, tB), pl.cdiv(E, tE)

    x_tile_bytes = tS * tB * tE * itemsize
    pe_tile_padded = tS * sub * tE * itemsize        # middle dim 1 pads to `sub` rows
    cparams = pltpu.CompilerParams(
        dimension_semantics=("parallel", "parallel", "parallel"),
        vmem_limit_bytes=_vmem_limit(x_tile_bytes, pe_tile_padded, cap),
    )
    out_shape = jax.ShapeDtypeStruct((S, B, E), x.dtype)

    if (not training) or p == 0.0:
        x_spec = pl.BlockSpec((tS, tB, tE), lambda si, ei, bi: (si, bi, ei))
        pe_spec = _pe_spec((tS, 1, tE), lambda si, ei, bi: (si, 0, ei))
        return pl.pallas_call(
            pe_add_kernel,
            out_shape=out_shape,
            grid_spec=pltpu.PrefetchScalarGridSpec(
                num_scalar_prefetch=0,
                grid=(nS, nE, nB),       # batch innermost -> pe tile stays resident
                in_specs=[x_spec, pe_spec],
                out_specs=x_spec,
            ),
            compiler_params=cparams,
        )(x, pe_slice)

    if p >= 1.0:
        return jnp.zeros_like(x)

    scale = 1.0 / (1.0 - p)
    seed_arr = jnp.asarray([seed], dtype=jnp.int32)

    # index_maps receive the scalar-prefetch seed ref as a trailing positional arg.
    x_spec = pl.BlockSpec((tS, tB, tE), lambda si, ei, bi, seed_ref: (si, bi, ei))
    pe_spec = _pe_spec((tS, 1, tE), lambda si, ei, bi, seed_ref: (si, 0, ei))

    # TODO(synk): exact torch.nn.Dropout RNG stream is not reproducible here;
    # keep/drop/rescale semantics are preserved via the counter-based hash mask.
    kern = functools.partial(pe_add_dropout_kernel, p=float(p), scale=float(scale),
                             stride_s=B * E, stride_b=E)
    return pl.pallas_call(
        kern,
        out_shape=out_shape,
        grid_spec=pltpu.PrefetchScalarGridSpec(
            num_scalar_prefetch=1,
            grid=(nS, nE, nB),
            in_specs=[x_spec, pe_spec],
            out_specs=x_spec,
        ),
        compiler_params=cparams,
    )(seed_arr, x, pe_slice)


# ---------------------------------------------------------------------------
# Main
# ---------------------------------------------------------------------------
if __name__ == "__main__":
    SEQ, BATCH, EMBED = 16, 4, 128          # lane-dense E; small but >1 grid step
    key = jax.random.PRNGKey(0)
    x = jax.random.normal(key, (SEQ, BATCH, EMBED), dtype=jnp.float32)

    pe_table = make_pe_table(EMBED, max_len=5000)          # (5000, 1, 128)

    # Eval-mode forward (dropout is identity): exact reference check.
    out = positional_encoding(x, pe_table, p=0.1, training=False)
    out = jax.block_until_ready(out)
    ref = x + pe_table[:SEQ].astype(x.dtype)               # broadcast over batch
    assert out.shape == (SEQ, BATCH, EMBED)
    assert jnp.allclose(out, ref, atol=1e-6), "mismatch vs reference (eval path)"

    # Training-mode forward (inverted dropout) — structural sanity checks:
    # every element is either 0 (dropped) or (x+pe)/(1-p) (kept & rescaled),
    # and the empirical keep fraction is close to 1-p.
    p = 0.1
    out_d = positional_encoding(x, pe_table, p=p, training=True, seed=123)
    out_d = jax.block_until_ready(out_d)
    scaled_ref = ref / (1.0 - p)
    ok = (out_d == 0) | (jnp.abs(out_d - scaled_ref) < 1e-4)
    assert bool(jnp.all(ok)), "dropout output not consistent with keep/drop semantics"
    keep_frac = float(jnp.mean((out_d != 0).astype(jnp.float32)))
    assert 0.80 <= keep_frac <= 0.97, f"implausible keep fraction {keep_frac} for p={p}"

    print("KERNEL_OK")
</pallas_src>

<mosaic_0001>
module attributes {stable_mosaic.version = 11 : i64} {
  func.func @pe_add_kernel(%arg0: i32, %arg1: i32, %arg2: i32, %arg3: memref<8x4x128xf32, #tpu.memory_space<vmem>>, %arg4: memref<8x1x128xf32, #tpu.memory_space<vmem>>, %arg5: memref<8x4x128xf32, #tpu.memory_space<vmem>>) attributes {dimension_semantics = [#tpu.dimension_semantics<parallel>, #tpu.dimension_semantics<parallel>, #tpu.dimension_semantics<parallel>], iteration_bounds = array<i64: 2, 1, 1>, scalar_prefetch = 0 : i64, scratch_operands = 0 : i64, tpu.core_type = #tpu.core_type<tc>, window_params = [{transform_indices = @transform_0, window_bounds = array<i64: 8, 4, 128>}, {transform_indices = @transform_1, window_bounds = array<i64: 8, 1, 128>}, {transform_indices = @transform_2, window_bounds = array<i64: 8, 4, 128>}]} {
    %c0 = arith.constant 0 : index
    %c0_0 = arith.constant 0 : index
    %c0_1 = arith.constant 0 : index
    %0 = vector.load %arg3[%c0, %c0_0, %c0_1] : memref<8x4x128xf32, #tpu.memory_space<vmem>>, vector<8x4x128xf32>
    %c0_2 = arith.constant 0 : index
    %c0_3 = arith.constant 0 : index
    %c0_4 = arith.constant 0 : index
    %1 = vector.load %arg4[%c0_2, %c0_3, %c0_4] : memref<8x1x128xf32, #tpu.memory_space<vmem>>, vector<8x1x128xf32>
    %2 = vector.broadcast %1 : vector<8x1x128xf32> to vector<8x4x128xf32>
    %3 = arith.addf %0, %2 : vector<8x4x128xf32>
    %c0_5 = arith.constant 0 : index
    %c0_6 = arith.constant 0 : index
    %c0_7 = arith.constant 0 : index
    %4 = vector.load %arg5[%c0_5, %c0_6, %c0_7] : memref<8x4x128xf32, #tpu.memory_space<vmem>>, vector<8x4x128xf32>
    tpu.vector_store %arg5[%c0_5, %c0_6, %c0_7], %3 {strides = array<i32>} : memref<8x4x128xf32, #tpu.memory_space<vmem>>, vector<8x4x128xf32>,
    return
  }
  func.func @transform_0(%arg0: i32, %arg1: i32, %arg2: i32) -> (i32, i32, i32) {
    %c0_i32 = arith.constant 0 : i32
    return %arg0, %arg2, %arg1 : i32, i32, i32
  }
  func.func @transform_1(%arg0: i32, %arg1: i32, %arg2: i32) -> (i32, i32, i32) {
    %c0_i32 = arith.constant 0 : i32
    %c0_i32_0 = arith.constant 0 : i32
    return %arg0, %c0_i32, %arg1 : i32, i32, i32
  }
  func.func @transform_2(%arg0: i32, %arg1: i32, %arg2: i32) -> (i32, i32, i32) {
    %c0_i32 = arith.constant 0 : i32
    return %arg0, %arg2, %arg1 : i32, i32, i32
  }
}

</mosaic_0001>

<bundles_post_ra>
// kernel: tpu_custom_call.1
= control target key start
LH: loop header
LB: loop body
LE: loop exit
PB: predicated region body
PF: predicated region fallthrough
CT: control target
= control target key end

     0   :  { %7 = vsyncpa [#allocation3], 0  ;;  %s981_s0 = inlined_call_operand.hbm [shape: f32[16,4,128], index: 0, kind: input, shape index: {}]   ;;  %s982_s1 = inlined_call_operand.hbm [shape: f32[16,1,128], index: 1, kind: input, shape index: {}]   ;;  %s983_s2 = inlined_call_operand.hbm [shape: f32[16,4,128], index: 2, kind: output, shape index: {}]  }
   0x1   :  { %9 = vsyncpa [#allocation3 + $0x1], 0 }
   0x2   :  { %10 = vsyncpa [#allocation6], 0 }
   0x3   :  { %12 = vsyncpa [#allocation6 + $0x1], 0 }
   0x4   :  { %13 = vsyncpa [#allocation4], 0 }
   0x5   :  { %15 = vsyncpa [#allocation4 + $0x1], 0  ;;  %s723_s9 = smov 0   ;;  %s725_s10 = smov 0  }
   0x6   :  { %s727_s11 = smov 0   ;;  %s729_s12 = smov 0  }
   0x7   :  { %s731_s13 = smov 0   ;;  %s733_s14 = smov 0  }
   0x8 LB: > { %s448_s15 = sadd.s32 4294967295, %s697_s14   ;;  %s449_s16 = sadd.s32 4294967294, %s697_s14   ;;  %s697_s14 = sphi %s733_s14, %s21_s14   ;;  %s693_s13 = sphi %s731_s13, %s1001_s13   ;;  %s689_s12 = sphi %s729_s12, %s1000_s12   ;;  %s685_s11 = sphi %s727_s11, %s999_s11   ;;  %s681_s10 = sphi %s725_s10, %s998_s10   ;;  %s677_s9 = sphi %s723_s9, %s997_s9  }
   0x9   : > { %s40_s17 = sadd.s32 1, %s693_s13  ;;  %s51_s18 = sadd.s32 1, %s685_s11 }
   0xa   : > { %p42_p0 = scmp.ge.s32.totalorder %s40_s17, 2  ;;  %p58_p1 = scmp.ne.s32.totalorder %s685_s11, %s681_s10 }
   0xb   : > { %p59_p2 = scmp.eq.s32.totalorder %s697_s14, 0  ;;  %p64_p3 = scmp.ne.s32.totalorder %s681_s10, %s677_s9 }
   0xc   : > { %s1003_s17 = smov (%p42_p0, %s40_s17), 0  ;;  %p65_p5 = scmp.eq.s32.totalorder %s448_s15, 0 }
   0xd   : > { %p764_p4 = por %p59_p2, %p58_p1  ;;  %s44_s20 = ssub.s32 %s693_s13, %s1003_s17 }
   0xe   : > { %p120_p6 = scmp.eq.s32.totalorder %s448_s15, 1  ;;  %p49_p7 = scmp.eq.s32.totalorder %s44_s20, 0 }
   0xf   : > { %p770_p8 = por %p65_p5, %p64_p3  ;;  %p126_p10 = scmp.eq.s32.totalorder %s449_s16, 1 }
  0x10   : > { %p774_p9 = por %p120_p6, %p58_p1  ;;  %p495_p13 = scmp.lt.s32.totalorder %s697_s14, 2 }
  0x11   : > { %s987_s21 = scalar_select %p770_p8, 1, 0 }
  0x12   : > { %s988_s22 = scalar_select %p774_p9, 1, 0 }
  0x13   : > { %s779_s23 = scalar_select %p49_p7, %s685_s11, %s51_s18  }
  0x14   : > { %p781_p11 = por %p126_p10, %p64_p3  ;;  %s788_s25 = sand.u32 1, %s685_s11  }
  0x15   : > { %s452_s26 = sshll.u32 %s788_s25, 5  ;;  %s475_s27 = sshll.u32 %s693_s13, 9 }
  0x16   : > { %s989_s24 = scalar_select %p781_p11, 1, 0 }
  0x17   : > { %s795_s30 = scalar_lea.hbm %s981_s0, %s475_s27  ;;  %s150_s3 = scalar_lea.vmem [#allocation2], %s452_s26 }
  0x18   : > { %s159_s4 = sshll.u32 %s150_s3, 4  ;;  %p801_p0 = pnand %p495_p13, %p764_p4  ;;  %s797_s4 = int_to_ptr.vmem [resolvable:$true] %s159_s4 }
  0x19   : > { %s147_s6 = scalar_lea.sflag [#allocation3], %s788_s25  ;;  %s551_s7 = scalar_lea.hbm %s795_s30, 512 }
  0x1a   : > { %p552_p2 = scmp.ne.s32.totalorder %s795_s30, %s551_s7  ;;  %p553_p3 = pneg %p801_p0 }
  0x1b   : > { %s556_s16 = scalar_lea.hbm %s981_s0, 1024  ;;  %p557_p4 = scmp.lt.u32.totalorder %s795_s30, %s981_s0 }
  0x1c   : > { %p554_p5 = pnand %p553_p3, %p552_p2  ;;  %p558_p7 = scmp.lt.u32.totalorder %s556_s16, %s551_s7 }
  0x1d   : > { %p560_p13 = scmp.lt.u32.totalorder %s551_s7, %s795_s30 }
  0x1e   : > { %p555_p6 = pneg %p554_p5  ;;  %p559_p10 = por %p558_p7, %p557_p4 }
  0x20   : > { %p561_p12 = por %p560_p13, %p559_p10 }
  0x22   : > { %p562_p1 = pnand %p561_p12, %p555_p6 }
  0x24   : > { %565 = shalt.err (!%p562_p1)
}
  0x25   : > { %s566_s20 = scalar_lea.vmem %s797_s4, 512  ;;  %s699_s26 = smov [#allocation2]  }
  0x26   : > { %p567_p2 = scmp.ne.s32.totalorder %s797_s4, %s566_s20  ;;  %s571_s27 = sshll.u32 %s699_s26, 4  ;;  %s572_s27 = int_to_ptr.vmem [resolvable:$false] %s571_s27 }
  0x27   : > { %s573_s28 = scalar_lea.vmem %s572_s27, 1024  ;;  %p574_p9 = scmp.lt.s32.totalorder %s797_s4, %s572_s27 }
  0x28   : > { %p569_p5 = pnand %p567_p2, %p553_p3  ;;  %p575_p4 = scmp.lt.s32.totalorder %s573_s28, %s566_s20 }
  0x2a   : > { %p570_p11 = pneg %p569_p5  ;;  %p576_p7 = por %p575_p4, %p574_p9 }
  0x2c   : > { %p577_p10 = pnand %p576_p7, %p570_p11 }
  0x2e   : > { %580 = shalt.err (!%p577_p10)
}
  0x2f   : > { %s700_s29 = smov 64   ;;  %s701_s3 = smov 4  }
  0x30   : > { %487 = dma.hbm_to_vmem [thread:$0]  (!%p801_p0), %s795_s30, 512, %s797_s4, %s147_s6, %s700_s29, %s700_s29, %s701_s3  }
  0x31   : > { %p189_p12 = scmp.lt.s32.totalorder %s697_s14, 3  ;;  %s455_s7 = sshll.u32 %s788_s25, 3 }
  0x32   : > { %s476_s8 = sshll.u32 %s693_s13, 7  ;;  %p991_p9 = scmp.ge.s32.totalorder %s697_s14, 1 }
  0x33   : > { %s846_s19 = scalar_lea.hbm %s982_s1, %s476_s8  ;;  %s173_s20 = scalar_lea.vmem [#allocation5], %s455_s7 }
  0x34   : > { %p839_p11 = pnand %p991_p9, %p189_p12  ;;  %s181_s26 = sshll.u32 %s173_s20, 4  ;;  %s848_s26 = int_to_ptr.vmem [resolvable:$true] %s181_s26 }
  0x35   : > { %s170_s30 = scalar_lea.sflag [#allocation6], %s788_s25  ;;  %s581_s4 = scalar_lea.hbm %s846_s19, 128 }
  0x36   : > { %p582_p1 = scmp.ne.s32.totalorder %s846_s19, %s581_s4  ;;  %s586_s28 = scalar_lea.hbm %s982_s1, 256 }
  0x37   : > { %p587_p2 = scmp.lt.u32.totalorder %s846_s19, %s982_s1  ;;  %p588_p5 = scmp.lt.u32.totalorder %s586_s28, %s581_s4 }
  0x38   : > { %p584_p6 = pnand %p582_p1, %p553_p3  ;;  %p590_p7 = scmp.lt.u32.totalorder %s581_s4, %s846_s19 }
  0x39   : > { %p589_p4 = por %p588_p5, %p587_p2 }
  0x3a   : > { %p585_p13 = pneg %p584_p6 }
  0x3b   : > { %p591_p10 = por %p590_p7, %p589_p4 }
  0x3d   : > { %p592_p12 = pnand %p591_p10, %p585_p13 }
  0x3f   : > { %595 = shalt.err (!%p592_p12)
}
  0x40   : > { %s596_s7 = scalar_lea.vmem %s848_s26, 128  ;;  %s702_s8 = smov [#allocation5]  }
  0x41   : > { %p597_p9 = scmp.ne.s32.totalorder %s848_s26, %s596_s7  ;;  %s601_s16 = sshll.u32 %s702_s8, 4  ;;  %s602_s16 = int_to_ptr.vmem [resolvable:$false] %s601_s16 }
  0x42   : > { %s603_s18 = scalar_lea.vmem %s602_s16, 256  ;;  %p604_p8 = scmp.lt.s32.totalorder %s848_s26, %s602_s16 }
  0x43   : > { %p599_p1 = pnand %p597_p9, %p553_p3  ;;  %p605_p2 = scmp.lt.s32.totalorder %s603_s18, %s596_s7 }
  0x45   : > { %p600_p6 = pneg %p599_p1  ;;  %p606_p5 = por %p605_p2, %p604_p8 }
  0x47   : > { %p607_p4 = pnand %p606_p5, %p600_p6 }
  0x49   : > { %610 = shalt.err (!%p607_p4)
}
  0x4a   : > { %s703_s20 = smov 16   ;;  %s704_s4 = smov 1  }
  0x4b   : > { %490 = dma.hbm_to_vmem [thread:$0]  (!%p801_p0), %s846_s19, 128, %s848_s26, %s170_s30, %s703_s20, %s703_s20, %s704_s4  }
  0x4c   : > { %193 = sbr.rel (%p839_p11) target bundleno = 119 (0x77), region = 28  ;;  %s879_s6 = sand.u32 (!%p839_p11), 1, %s681_s10  }
  0x4d   : > { %s459_s27 = sshll.u32 (!%p839_p11), %s879_s6, 5  ;;  %s196_s28 = scalar_lea.sflag (!%p839_p11), [#allocation3], %s879_s6 }
  0x4e   : > { %s883_s29 = scalar_lea.vmem (!%p839_p11), [#allocation2], %s459_s27  ;;  %p993_p8 = scmp.ne.s32.totalorder (!%p839_p11), %s987_s21, 0 }
  0x53   : > { %664 = dma.done.wait (%p993_p8), %s196_s28, 512  }
  0x54   : > { %666 = vsyncadd (%p993_p8), %s196_s28, 4294966784  ;;  %s460_s25 = sshll.u32 %s879_s6, 3  ;;  %s205_s5 = scalar_lea.sflag [#allocation6], %s879_s6 }
  0x55   : > { %s891_s15 = scalar_lea.vmem [#allocation5], %s460_s25 }
  0x56   : > { %668 = dma.done.wait (%p993_p8), %s205_s5, 128  }
  0x57   : > { %670 = vsyncadd (%p993_p8), %s205_s5, 4294967168  ;;  %s897_s19 = scalar_lea.vmem [#allocation7], %s459_s27  ;;  %s477_s30 = sshll.u32 %s689_s12, 9  ;;  %v237_v0 = vld [vmem:[%s883_s29] sm:$0xf] }
  0x58   : > { %s333_s26 = sshll.u32 %s897_s19, 4  ;;  %v462_v1 = vld [vmem:[%s891_s15] ss:$0 sm:$0xff]  ;;  %v238_v2 = vld [vmem:[%s883_s29 + $0x4] sm:$0xf]  ;;  %s928_s7 = scalar_lea.hbm %s983_s2, %s477_s30  ;;  %s919_s26 = int_to_ptr.vmem [resolvable:$true] %s333_s26 }
  0x59   : > { %v301_v3 = vadd.f32 %v462_v1, %v237_v0  ;;  %v463_v4 = vld [vmem:[%s891_s15 + $0x1] ss:$0 sm:$0xff]  ;;  %v464_v6 = vld [vmem:[%s891_s15 + $0x2] ss:$0 sm:$0xff]  ;;  %v240_v9 = vld [vmem:[%s883_s29 + $0xc] sm:$0xf] }
  0x5a   : > { %v239_v5 = vld [vmem:[%s883_s29 + $0x8] sm:$0xf]  ;;  %v302_v7 = vadd.f32 %v463_v4, %v238_v2  ;;  %v241_v11 = vld [vmem:[%s883_s29 + $0x10] sm:$0xf]  ;;  %v466_v13 = vld [vmem:[%s891_s15 + $0x4] ss:$0 sm:$0xff] }
  0x5b   : > { %v303_v8 = vadd.f32 %v464_v6, %v239_v5  ;;  %v465_v10 = vld [vmem:[%s891_s15 + $0x3] ss:$0 sm:$0xff]  ;;  %309 = vst [vmem:[%s897_s19] sm:$0xf] %v301_v3  ;;  %v242_v14 = vld [vmem:[%s883_s29 + $0x14] sm:$0xf]  ;;  %v305_v16 = vadd.f32 %v466_v13, %v241_v11  ;;  %s318_s8 = scalar_lea.sflag [#allocation4], %s879_s6 }
  0x5c   : > { %v304_v12 = vadd.f32 %v465_v10, %v240_v9  ;;  %v467_v15 = vld [vmem:[%s891_s15 + $0x5] ss:$0 sm:$0xff]  ;;  %310 = vst [vmem:[%s897_s19 + $0x4] sm:$0xf] %v302_v7  ;;  %v243_v18 = vld [vmem:[%s883_s29 + $0x18] sm:$0xf] }
  0x5d   : > { %311 = vst [vmem:[%s897_s19 + $0x8] sm:$0xf] %v303_v8  ;;  %v306_v17 = vadd.f32 %v467_v15, %v242_v14  ;;  %v468_v19 = vld [vmem:[%s891_s15 + $0x6] ss:$0 sm:$0xff]  ;;  %v244_v20 = vld [vmem:[%s883_s29 + $0x1c] sm:$0xf] }
  0x5e   : > { %312 = vst [vmem:[%s897_s19 + $0xc] sm:$0xf] %v304_v12  ;;  %v307_v21 = vadd.f32 %v468_v19, %v243_v18  ;;  %v469_v22 = vld [vmem:[%s891_s15 + $0x7] ss:$0 sm:$0xff]  ;;  %313 = vst [vmem:[%s897_s19 + $0x10] sm:$0xf] %v305_v16 }
  0x5f   : > { %314 = vst [vmem:[%s897_s19 + $0x14] sm:$0xf] %v306_v17  ;;  %v308_v23 = vadd.f32 %v469_v22, %v244_v20  ;;  %s611_s16 = scalar_lea.vmem %s919_s26, 512  ;;  %p994_p3 = scmp.ne.s32.totalorder %s988_s22, 0 }
  0x60   : > { %315 = vst [vmem:[%s897_s19 + $0x18] sm:$0xf] %v307_v21  ;;  %p612_p0 = scmp.ne.s32.totalorder %s919_s26, %s611_s16  ;;  %s705_s18 = smov [#allocation7]  }
  0x61   : > { %316 = vst [vmem:[%s897_s19 + $0x1c] sm:$0xf] %v308_v23  ;;  %s615_s20 = sshll.u32 %s705_s18, 4  ;;  %s616_s20 = int_to_ptr.vmem [resolvable:$false] %s615_s20 }
  0x62   : > { %p613_p11 = pnand %p612_p0, %p994_p3  ;;  %s617_s12 = scalar_lea.vmem %s616_s20, 1024 }
  0x63   : > { %p618_p7 = scmp.lt.s32.totalorder %s919_s26, %s616_s20  ;;  %p619_p10 = scmp.lt.s32.totalorder %s617_s12, %s611_s16 }
  0x64   : > { %p614_p13 = pneg %p613_p11 }
  0x65   : > { %p620_p12 = por %p619_p10, %p618_p7 }
  0x67   : > { %p621_p9 = pnand %p620_p12, %p614_p13 }
  0x69   : > { %624 = shalt.err (!%p621_p9)
}
  0x6a   : > { %s625_s4 = scalar_lea.hbm %s928_s7, 512  ;;  %s629_s29 = scalar_lea.hbm %s983_s2, 1024 }
  0x6b   : > { %p626_p1 = scmp.ne.s32.totalorder %s928_s7, %s625_s4  ;;  %p630_p5 = scmp.lt.u32.totalorder %s928_s7, %s983_s2 }
  0x6c   : > { %p631_p4 = scmp.lt.u32.totalorder %s629_s29, %s625_s4  ;;  %p633_p0 = scmp.lt.u32.totalorder %s625_s4, %s928_s7 }
  0x6d   : > { %p627_p6 = pnand %p626_p1, %p994_p3 }
  0x6e   : > { %p632_p8 = por %p631_p4, %p630_p5 }
  0x6f   : > { %p628_p2 = pneg %p627_p6 }
  0x70   : > { %p634_p11 = por %p633_p0, %p632_p8 }
  0x72   : > { %p635_p13 = pnand %p634_p11, %p628_p2 }
  0x74   : > { %638 = shalt.err (!%p635_p13)
}
  0x75   : > { %s706_s15 = smov 64   ;;  %s707_s19 = smov 4  }
  0x76   : > { %482 = dma.vmem_to_hbm [thread:$0]  (%p994_p3), %s919_s26, 512, %s928_s7, %s318_s8, %s706_s15, %s706_s15, %s707_s19  }
  0x77 PF: > { %s348_s30 = sand.u32 1, %s677_s9   ;;  %p995_p7 = scmp.ne.s32.totalorder %s989_s24, 0 }
  0x78   : > { %p996_p10 = scmp.ge.s32.totalorder %s697_s14, 2  ;;  %s349_s21 = scalar_lea.sflag [#allocation4], %s348_s30 }
  0x7a   : > { %p492_p12 = pnand %p996_p10, %p995_p7 }
  0x7c   : > { %672 = dma.done.wait (!%p492_p12), %s349_s21, 512  }
  0x7d   : > { %674 = vsyncadd (!%p492_p12), %s349_s21, 4294966784  ;;  %s21_s14 = sadd.s32 1, %s697_s14   ;;  %s997_s9 = smov %s681_s10 }
  0x7e   : > { %p18_p9 = scmp.ge.s32.totalorder %s21_s14, 4   ;;  %s998_s10 = smov %s685_s11 }
  0x7f   : > { %s999_s11 = smov %s779_s23  ;;  %s1000_s12 = smov %s693_s13 }
  0x80   : > { %s1001_s13 = smov %s1003_s17  ;;  %20 = sbr.rel (!%p18_p9) target bundleno = 8 (0x8), region = 86 }
  0x87   :  { %354 = vsyncpa [#allocation3], 1 }
  0x88   :  { %356 = vsyncpa [#allocation3 + $0x1], 1 }
  0x89   :  { %357 = vsyncpa [#allocation6], 1 }
  0x8a   :  { %359 = vsyncpa [#allocation6 + $0x1], 1 }
  0x8b   :  { %360 = vsyncpa [#allocation4], 1 }
  0x8c   :  { %362 = vsyncpa [#allocation4 + $0x1], 1 }

</bundles_post_ra>
